<compile_context>
chip_gen: v5e
topology: v5e:2x2
jax: 0.10.0
libtpu: 0.0.40
codegen_flags: <defaults>
</compile_context>

<pallas_src>
import functools

import jax
import jax.numpy as jnp
import numpy as np
from jax.experimental import pallas as pl
from jax.experimental.pallas import tpu as pltpu


def _round_up(x, m):
    return ((x + m - 1) // m) * m


# --------------------------------------------------------------------------------
# Kernel
# --------------------------------------------------------------------------------
def _decoder_lstm_kernel(tok_ref, emb_ref, w_ref, b_ref, h0_ref, c0_ref,
                         out_ref, c_out_ref, h_sc, c_sc, *, hp, n_layers):
    """One decode step per grid iteration; fused weights stay resident in VMEM."""
    del tok_ref  # token ids are only consumed by the embedding-row index_map
    Hp = hp

    @pl.when(pl.program_id(0) == 0)
    def _():
        h_sc[...] = h0_ref[...]
        c_sc[...] = c0_ref[...]

    x = emb_ref[0]            # (1, Hp)  embedded token row (gathered by index_map)
    h = h_sc[...]             # (1, Hp)
    c = c_sc[...]             # (1, Hp)

    out = x
    # The torch module re-applies the SAME lstm module n_layers times.
    for _ in range(n_layers):
        xr = jnp.maximum(out, 0.0)                                   # F.relu
        # Fused gate matmul: [relu(x); h] @ W_fused  (bf16 MXU inputs, f32 acc).
        xh = jnp.concatenate([xr, h], axis=1).astype(w_ref.dtype)    # (1, 2Hp)
        gates = jnp.dot(xh, w_ref[...],
                        preferred_element_type=jnp.float32) + b_ref[...]  # (1, 4Hp)
        i_g = jax.nn.sigmoid(gates[:, 0 * Hp:1 * Hp])
        f_g = jax.nn.sigmoid(gates[:, 1 * Hp:2 * Hp])
        g_g = jnp.tanh(gates[:, 2 * Hp:3 * Hp])
        o_g = jax.nn.sigmoid(gates[:, 3 * Hp:4 * Hp])
        c = f_g * c + i_g * g_g
        h = o_g * jnp.tanh(c)
        out = h

    h_sc[...] = h
    c_sc[...] = c
    out_ref[0] = h            # per-step output (== hidden after the layer loop)
    c_out_ref[...] = c        # resident output block -> written back once at the end


# --------------------------------------------------------------------------------
# Parameter preparation (done ONCE, not per forward call)
# --------------------------------------------------------------------------------
def prepare_params(params, *, weight_dtype=jnp.bfloat16):
    """Pre-transpose + fuse + gate-pad the LSTM weights and pad the embedding."""
    emb = params["embedding"]          # (V, H)
    w_ih = params["w_ih"]              # (4H, H) torch layout
    w_hh = params["w_hh"]              # (4H, H)
    b = params["b_ih"] + params["b_hh"]

    V, H = emb.shape
    Hp = max(128, _round_up(H, 128))   # lane-aligned hidden size

    wt_i = jnp.transpose(w_ih)         # (H, 4H)
    wt_h = jnp.transpose(w_hh)         # (H, 4H)

    # Fused weight: rows = [x features | pad | h features | pad], cols = per-gate
    # padded blocks so gate k lives in lanes [k*Hp, k*Hp+H).  Padded rows/cols are
    # zero, so padded state lanes stay exactly zero across steps.
    w_fused = jnp.zeros((2 * Hp, 4 * Hp), jnp.float32)
    bias = jnp.zeros((1, 4 * Hp), jnp.float32)
    for k in range(4):
        w_fused = w_fused.at[0:H, k * Hp:k * Hp + H].set(wt_i[:, k * H:(k + 1) * H])
        w_fused = w_fused.at[Hp:Hp + H, k * Hp:k * Hp + H].set(wt_h[:, k * H:(k + 1) * H])
        bias = bias.at[0, k * Hp:k * Hp + H].set(b[k * H:(k + 1) * H])

    emb_p = jnp.zeros((V, 1, Hp), jnp.float32).at[:, 0, :H].set(emb)

    return {
        "H": H,
        "Hp": Hp,
        "V": V,
        "emb": emb_p,                              # (V, 1, Hp) f32
        "w_fused": w_fused.astype(weight_dtype),   # (2Hp, 4Hp) bf16
        "bias": bias,                              # (1, 4Hp) f32
    }


# --------------------------------------------------------------------------------
# Wrappers
# --------------------------------------------------------------------------------
def _run_decode(tokens, hidden, cell, prep, *, n_layers):
    H, Hp = prep["H"], prep["Hp"]
    T = int(tokens.shape[0])

    emb3 = prep["emb"]
    w_fused = prep["w_fused"]
    bias = prep["bias"]
    tok_ids = jnp.asarray(tokens, jnp.int32).reshape(T)

    h0p = jnp.zeros((1, Hp), jnp.float32).at[:, :H].set(hidden.reshape(1, H))
    c0p = jnp.zeros((1, Hp), jnp.float32).at[:, :H].set(cell.reshape(1, H))

    kernel = functools.partial(_decoder_lstm_kernel, hp=Hp, n_layers=n_layers)

    # VMEM budget: fused bf16 weight (default pipeline double-buffers it) plus the
    # small activation/state/output tiles; clamp well under v7x's 64 MiB physical.
    # TODO(synk): at production H, single-buffer the weight (pl.Buffered(1)) and
    # tile the 4H output axis over a grid dim to stay under the v7x VMEM budget.
    w_bytes = int(w_fused.size) * w_fused.dtype.itemsize
    est = 2 * w_bytes + 4 * (T * Hp + 16 * Hp) * 4
    vmem_limit = int(min(max(est + (2 << 20), 16 << 20), 48 << 20))

    out_seq, c_fin = pl.pallas_call(
        kernel,
        out_shape=(
            jax.ShapeDtypeStruct((T, 1, Hp), jnp.float32),   # per-step hidden
            jax.ShapeDtypeStruct((1, Hp), jnp.float32),      # final cell
        ),
        grid_spec=pltpu.PrefetchScalarGridSpec(
            num_scalar_prefetch=1,
            grid=(T,),
            in_specs=[
                # embedding-row gather via the scalar-prefetched token ids
                pl.BlockSpec((1, 1, Hp), lambda t, tok: (tok[t], 0, 0)),
                # fused weight / bias / initial state: constant block index
                # -> DMA'd once and VMEM-resident for the whole sequence
                pl.BlockSpec((2 * Hp, 4 * Hp), lambda t, tok: (0, 0)),
                pl.BlockSpec((1, 4 * Hp), lambda t, tok: (0, 0)),
                pl.BlockSpec((1, Hp), lambda t, tok: (0, 0)),
                pl.BlockSpec((1, Hp), lambda t, tok: (0, 0)),
            ],
            out_specs=(
                pl.BlockSpec((1, 1, Hp), lambda t, tok: (t, 0, 0)),
                pl.BlockSpec((1, Hp), lambda t, tok: (0, 0)),
            ),
            scratch_shapes=[
                pltpu.VMEM((1, Hp), jnp.float32),   # h recurrent state
                pltpu.VMEM((1, Hp), jnp.float32),   # c recurrent state
            ],
        ),
        compiler_params=pltpu.CompilerParams(
            dimension_semantics=("arbitrary",),     # recurrence -> sequential steps
            vmem_limit_bytes=vmem_limit,
        ),
    )(tok_ids, emb3, w_fused, bias, h0p, c0p)

    outs = out_seq[:, 0, :H]            # (T, H)
    h_fin = out_seq[T - 1, :, :H]       # (1, H)  (== last per-step output)
    c_f = c_fin[:, :H]                  # (1, H)
    return outs, h_fin, c_f


def decoder_rnn_forward(token, hidden, cell, prep, *, n_layers=1):
    """Pallas implementation of DecoderRNN.forward (one token step)."""
    H = prep["H"]
    tokens = jnp.asarray(token, jnp.int32).reshape(1)
    outs, h1, c1 = _run_decode(tokens, hidden, cell, prep, n_layers=n_layers)
    return outs.reshape(1, 1, H), h1.reshape(1, 1, H), c1.reshape(1, 1, H)


def decoder_rnn_decode(tokens, hidden, cell, prep, *, n_layers=1):
    """T chained DecoderRNN.forward steps in ONE kernel (weights stay resident)."""
    H = prep["H"]
    T = int(tokens.shape[0])
    outs, hT, cT = _run_decode(tokens, hidden, cell, prep, n_layers=n_layers)
    return outs.reshape(T, 1, H), hT.reshape(1, 1, H), cT.reshape(1, 1, H)


# --------------------------------------------------------------------------------
# Pure-JAX reference (mirrors kernel numerics: bf16 weights / matmul inputs,
# f32 accumulation, f32 gates and state) and parameter init
# --------------------------------------------------------------------------------
def _reference_forward(token, hidden, cell, params, *, n_layers=1):
    H = params["embedding"].shape[1]
    x = params["embedding"][token].reshape(1, H)
    h = hidden.reshape(1, H)
    c = cell.reshape(1, H)
    w = jnp.concatenate([params["w_ih"].T, params["w_hh"].T], axis=0).astype(jnp.bfloat16)
    b = (params["b_ih"] + params["b_hh"]).reshape(1, 4 * H)
    out = x
    for _ in range(n_layers):
        xr = jnp.maximum(out, 0.0)
        xh = jnp.concatenate([xr, h], axis=1).astype(jnp.bfloat16)
        gates = jnp.dot(xh, w, preferred_element_type=jnp.float32) + b
        i_g = jax.nn.sigmoid(gates[:, 0 * H:1 * H])
        f_g = jax.nn.sigmoid(gates[:, 1 * H:2 * H])
        g_g = jnp.tanh(gates[:, 2 * H:3 * H])
        o_g = jax.nn.sigmoid(gates[:, 3 * H:4 * H])
        c = f_g * c + i_g * g_g
        h = o_g * jnp.tanh(c)
        out = h
    return out.reshape(1, 1, H), h.reshape(1, 1, H), c.reshape(1, 1, H)


def init_params(key, hidden_size, output_size):
    """Deterministic synthetic parameters (shapes match nn.Embedding / nn.LSTM)."""
    k_emb, k_ih, k_hh, k_bih, k_bhh = jax.random.split(key, 5)
    bound = 1.0 / np.sqrt(hidden_size)
    return {
        "embedding": jax.random.normal(k_emb, (output_size, hidden_size), jnp.float32),
        "w_ih": jax.random.uniform(k_ih, (4 * hidden_size, hidden_size), jnp.float32, -bound, bound),
        "w_hh": jax.random.uniform(k_hh, (4 * hidden_size, hidden_size), jnp.float32, -bound, bound),
        "b_ih": jax.random.uniform(k_bih, (4 * hidden_size,), jnp.float32, -bound, bound),
        "b_hh": jax.random.uniform(k_bhh, (4 * hidden_size,), jnp.float32, -bound, bound),
    }


if __name__ == "__main__":
    hidden_size = 32
    output_size = 16   # vocab size
    n_layers = 1
    seq_len = 8

    key = jax.random.PRNGKey(0)
    params = init_params(key, hidden_size, output_size)
    prep = prepare_params(params)          # one-time weight fuse/transpose/pad/bf16

    hidden = jnp.zeros((1, 1, hidden_size), jnp.float32)   # DecoderRNN.initHidden()
    cell = jnp.zeros((1, 1, hidden_size), jnp.float32)     # DecoderRNN.initCell()

    # ---- single-step forward (exact module semantics) ----
    token = jnp.int32(3)
    out, h1, c1 = decoder_rnn_forward(token, hidden, cell, prep, n_layers=n_layers)
    jax.block_until_ready((out, h1, c1))

    r_out, r_h, r_c = _reference_forward(int(token), hidden, cell, params, n_layers=n_layers)
    assert out.shape == (1, 1, hidden_size)
    assert np.allclose(np.asarray(out), np.asarray(r_out), atol=1e-4)
    assert np.allclose(np.asarray(h1), np.asarray(r_h), atol=1e-4)
    assert np.allclose(np.asarray(c1), np.asarray(r_c), atol=1e-4)

    # ---- multi-step decode: one kernel, weights resident across all steps ----
    tokens = jax.random.randint(jax.random.PRNGKey(1), (seq_len,), 0, output_size, jnp.int32)
    outs, hT, cT = decoder_rnn_decode(tokens, hidden, cell, prep, n_layers=n_layers)
    jax.block_until_ready((outs, hT, cT))

    rh, rc = hidden, cell
    ref_outs = []
    for t in range(seq_len):
        ro, rh, rc = _reference_forward(int(tokens[t]), rh, rc, params, n_layers=n_layers)
        ref_outs.append(np.asarray(ro).reshape(hidden_size))
    ref_outs = np.stack(ref_outs)

    assert outs.shape == (seq_len, 1, hidden_size)
    assert np.allclose(np.asarray(outs).reshape(seq_len, hidden_size), ref_outs, atol=1e-4)
    assert np.allclose(np.asarray(hT), np.asarray(rh), atol=1e-4)
    assert np.allclose(np.asarray(cT), np.asarray(rc), atol=1e-4)

    print("KERNEL_OK")
</pallas_src>

<mosaic_0001>
module attributes {stable_mosaic.version = 11 : i64} {
  func.func @_decoder_lstm_kernel(%arg0: i32, %arg1: memref<1xi32, #tpu.memory_space<smem>>, %arg2: memref<1x1x128xf32, #tpu.memory_space<vmem>>, %arg3: memref<256x512xbf16, #tpu.memory_space<vmem>>, %arg4: memref<1x512xf32, #tpu.memory_space<vmem>>, %arg5: memref<1x128xf32, #tpu.memory_space<vmem>>, %arg6: memref<1x128xf32, #tpu.memory_space<vmem>>, %arg7: memref<1x1x128xf32, #tpu.memory_space<vmem>>, %arg8: memref<1x128xf32, #tpu.memory_space<vmem>>, %arg9: memref<1x128xf32, #tpu.memory_space<vmem>>, %arg10: memref<1x128xf32, #tpu.memory_space<vmem>>) attributes {dimension_semantics = [#tpu.dimension_semantics<arbitrary>], iteration_bounds = array<i64: 1>, scalar_prefetch = 1 : i64, scratch_operands = 2 : i64, tpu.core_type = #tpu.core_type<tc>, window_params = [{transform_indices = @transform_0, window_bounds = array<i64: 1, 1, 128>}, {pipeline_mode = #tpu.pipeline_mode<synchronous>, transform_indices = @transform_1, window_bounds = array<i64: 256, 512>}, {pipeline_mode = #tpu.pipeline_mode<synchronous>, transform_indices = @transform_2, window_bounds = array<i64: 1, 512>}, {pipeline_mode = #tpu.pipeline_mode<synchronous>, transform_indices = @transform_3, window_bounds = array<i64: 1, 128>}, {pipeline_mode = #tpu.pipeline_mode<synchronous>, transform_indices = @transform_4, window_bounds = array<i64: 1, 128>}, {transform_indices = @transform_5, window_bounds = array<i64: 1, 1, 128>}, {pipeline_mode = #tpu.pipeline_mode<synchronous>, transform_indices = @transform_6, window_bounds = array<i64: 1, 128>}]} {
    %c0_i32 = arith.constant 0 : i32
    %0 = arith.cmpi eq, %arg0, %c0_i32 : i32
    %1 = arith.extui %0 : i1 to i32
    %c0_i32_0 = arith.constant 0 : i32
    %2 = arith.cmpi ne, %1, %c0_i32_0 : i32
    scf.if %2 {
      %c0_24 = arith.constant 0 : index
      %c0_25 = arith.constant 0 : index
      %46 = vector.load %arg5[%c0_24, %c0_25] : memref<1x128xf32, #tpu.memory_space<vmem>>, vector<1x128xf32>
      %c0_26 = arith.constant 0 : index
      %c0_27 = arith.constant 0 : index
      %47 = vector.load %arg9[%c0_26, %c0_27] : memref<1x128xf32, #tpu.memory_space<vmem>>, vector<1x128xf32>
      tpu.vector_store %arg9[%c0_26, %c0_27], %46 {strides = array<i32>} : memref<1x128xf32, #tpu.memory_space<vmem>>, vector<1x128xf32>,
      %c0_28 = arith.constant 0 : index
      %c0_29 = arith.constant 0 : index
      %48 = vector.load %arg6[%c0_28, %c0_29] : memref<1x128xf32, #tpu.memory_space<vmem>>, vector<1x128xf32>
      %c0_30 = arith.constant 0 : index
      %c0_31 = arith.constant 0 : index
      %49 = vector.load %arg10[%c0_30, %c0_31] : memref<1x128xf32, #tpu.memory_space<vmem>>, vector<1x128xf32>
      tpu.vector_store %arg10[%c0_30, %c0_31], %48 {strides = array<i32>} : memref<1x128xf32, #tpu.memory_space<vmem>>, vector<1x128xf32>,
    } else {
    }
    %c0 = arith.constant 0 : index
    %c0_1 = arith.constant 0 : index
    %c0_2 = arith.constant 0 : index
    %3 = vector.load %arg2[%c0, %c0_1, %c0_2] : memref<1x1x128xf32, #tpu.memory_space<vmem>>, vector<1x1x128xf32>
    %4 = vector.shape_cast %3 : vector<1x1x128xf32> to vector<1x128xf32>
    %c0_3 = arith.constant 0 : index
    %c0_4 = arith.constant 0 : index
    %5 = vector.load %arg9[%c0_3, %c0_4] : memref<1x128xf32, #tpu.memory_space<vmem>>, vector<1x128xf32>
    %c0_5 = arith.constant 0 : index
    %c0_6 = arith.constant 0 : index
    %6 = vector.load %arg10[%c0_5, %c0_6] : memref<1x128xf32, #tpu.memory_space<vmem>>, vector<1x128xf32>
    %cst = arith.constant 0.000000e+00 : f32
    %7 = vector.broadcast %cst : f32 to vector<1x128xf32>
    %8 = arith.maximumf %4, %7 : vector<1x128xf32>
    %9 = tpu.concatenate %8, %5 in 1 : vector<1x128xf32>, vector<1x128xf32> -> vector<1x256xf32>
    %10 = arith.truncf %9 : vector<1x256xf32> to vector<1x256xbf16>
    %c0_7 = arith.constant 0 : index
    %c0_8 = arith.constant 0 : index
    %11 = vector.load %arg3[%c0_7, %c0_8] : memref<256x512xbf16, #tpu.memory_space<vmem>>, vector<256x512xbf16>
    %cst_9 = arith.constant dense<0.000000e+00> : vector<1x512xf32>
    %12 = tpu.matmul %10, %11, %cst_9 {dimension_numbers = #tpu.dot_dimension_numbers<[1], [0], [0], [1], [0, 0, 1, 1], [], []>} : vector<1x256xbf16>, vector<256x512xbf16>, vector<1x512xf32> -> vector<1x512xf32>
    %c0_10 = arith.constant 0 : index
    %c0_11 = arith.constant 0 : index
    %13 = vector.load %arg4[%c0_10, %c0_11] : memref<1x512xf32, #tpu.memory_space<vmem>>, vector<1x512xf32>
    %14 = arith.addf %12, %13 : vector<1x512xf32>
    %15 = vector.extract_strided_slice %14 {offsets = [0, 0], sizes = [1, 128], strides = [1, 1]} : vector<1x512xf32> to vector<1x128xf32>
    %16 = arith.negf %15 : vector<1x128xf32>
    %17 = math.exp %16 : vector<1x128xf32>
    %cst_12 = arith.constant 1.000000e+00 : f32
    %18 = vector.broadcast %cst_12 : f32 to vector<1x128xf32>
    %19 = arith.addf %18, %17 : vector<1x128xf32>
    %20 = arith.divf %18, %19 : vector<1x128xf32>
    %21 = vector.extract_strided_slice %14 {offsets = [0, 128], sizes = [1, 128], strides = [1, 1]} : vector<1x512xf32> to vector<1x128xf32>
    %22 = arith.negf %21 : vector<1x128xf32>
    %23 = math.exp %22 : vector<1x128xf32>
    %cst_13 = arith.constant 1.000000e+00 : f32
    %24 = vector.broadcast %cst_13 : f32 to vector<1x128xf32>
    %25 = arith.addf %24, %23 : vector<1x128xf32>
    %26 = arith.divf %24, %25 : vector<1x128xf32>
    %27 = vector.extract_strided_slice %14 {offsets = [0, 256], sizes = [1, 128], strides = [1, 1]} : vector<1x512xf32> to vector<1x128xf32>
    %28 = math.tanh %27 : vector<1x128xf32>
    %29 = vector.extract_strided_slice %14 {offsets = [0, 384], sizes = [1, 128], strides = [1, 1]} : vector<1x512xf32> to vector<1x128xf32>
    %30 = arith.negf %29 : vector<1x128xf32>
    %31 = math.exp %30 : vector<1x128xf32>
    %cst_14 = arith.constant 1.000000e+00 : f32
    %32 = vector.broadcast %cst_14 : f32 to vector<1x128xf32>
    %33 = arith.addf %32, %31 : vector<1x128xf32>
    %34 = arith.divf %32, %33 : vector<1x128xf32>
    %35 = arith.mulf %26, %6 : vector<1x128xf32>
    %36 = arith.mulf %20, %28 : vector<1x128xf32>
    %37 = arith.addf %35, %36 : vector<1x128xf32>
    %38 = math.tanh %37 : vector<1x128xf32>
    %39 = arith.mulf %34, %38 : vector<1x128xf32>
    %c0_15 = arith.constant 0 : index
    %c0_16 = arith.constant 0 : index
    %40 = vector.load %arg9[%c0_15, %c0_16] : memref<1x128xf32, #tpu.memory_space<vmem>>, vector<1x128xf32>
    tpu.vector_store %arg9[%c0_15, %c0_16], %39 {strides = array<i32>} : memref<1x128xf32, #tpu.memory_space<vmem>>, vector<1x128xf32>,
    %c0_17 = arith.constant 0 : index
    %c0_18 = arith.constant 0 : index
    %41 = vector.load %arg10[%c0_17, %c0_18] : memref<1x128xf32, #tpu.memory_space<vmem>>, vector<1x128xf32>
    tpu.vector_store %arg10[%c0_17, %c0_18], %37 {strides = array<i32>} : memref<1x128xf32, #tpu.memory_space<vmem>>, vector<1x128xf32>,
    %c0_19 = arith.constant 0 : index
    %c0_20 = arith.constant 0 : index
    %c0_21 = arith.constant 0 : index
    %42 = vector.load %arg7[%c0_19, %c0_20, %c0_21] : memref<1x1x128xf32, #tpu.memory_space<vmem>>, vector<1x1x128xf32>
    %43 = vector.shape_cast %42 : vector<1x1x128xf32> to vector<1x128xf32>
    %44 = vector.shape_cast %39 : vector<1x128xf32> to vector<1x1x128xf32>
    tpu.vector_store %arg7[%c0_19, %c0_20, %c0_21], %44 {strides = array<i32>} : memref<1x1x128xf32, #tpu.memory_space<vmem>>, vector<1x1x128xf32>,
    %c0_22 = arith.constant 0 : index
    %c0_23 = arith.constant 0 : index
    %45 = vector.load %arg8[%c0_22, %c0_23] : memref<1x128xf32, #tpu.memory_space<vmem>>, vector<1x128xf32>
    tpu.vector_store %arg8[%c0_22, %c0_23], %37 {strides = array<i32>} : memref<1x128xf32, #tpu.memory_space<vmem>>, vector<1x128xf32>,
    return
  }
  func.func @transform_0(%arg0: i32, %arg1: memref<1xi32, #tpu.memory_space<smem>>) -> (i32, i32, i32) {
    %0 = arith.index_cast %arg0 : i32 to index
    %1 = memref.load %arg1[%0] : memref<1xi32, #tpu.memory_space<smem>>
    %c0_i32 = arith.constant 0 : i32
    %c0_i32_0 = arith.constant 0 : i32
    %c0_i32_1 = arith.constant 0 : i32
    return %1, %c0_i32, %c0_i32_0 : i32, i32, i32
  }
  func.func @transform_1(%arg0: i32, %arg1: memref<1xi32, #tpu.memory_space<smem>>) -> (i32, i32) {
    %c0_i32 = arith.constant 0 : i32
    %c0_i32_0 = arith.constant 0 : i32
    %c0_i32_1 = arith.constant 0 : i32
    return %c0_i32, %c0_i32_0 : i32, i32
  }
  func.func @transform_2(%arg0: i32, %arg1: memref<1xi32, #tpu.memory_space<smem>>) -> (i32, i32) {
    %c0_i32 = arith.constant 0 : i32
    %c0_i32_0 = arith.constant 0 : i32
    %c0_i32_1 = arith.constant 0 : i32
    return %c0_i32, %c0_i32_0 : i32, i32
  }
  func.func @transform_3(%arg0: i32, %arg1: memref<1xi32, #tpu.memory_space<smem>>) -> (i32, i32) {
    %c0_i32 = arith.constant 0 : i32
    %c0_i32_0 = arith.constant 0 : i32
    %c0_i32_1 = arith.constant 0 : i32
    return %c0_i32, %c0_i32_0 : i32, i32
  }
  func.func @transform_4(%arg0: i32, %arg1: memref<1xi32, #tpu.memory_space<smem>>) -> (i32, i32) {
    %c0_i32 = arith.constant 0 : i32
    %c0_i32_0 = arith.constant 0 : i32
    %c0_i32_1 = arith.constant 0 : i32
    return %c0_i32, %c0_i32_0 : i32, i32
  }
  func.func @transform_5(%arg0: i32, %arg1: memref<1xi32, #tpu.memory_space<smem>>) -> (i32, i32, i32) {
    %c0_i32 = arith.constant 0 : i32
    %c0_i32_0 = arith.constant 0 : i32
    %c0_i32_1 = arith.constant 0 : i32
    return %arg0, %c0_i32, %c0_i32_0 : i32, i32, i32
  }
  func.func @transform_6(%arg0: i32, %arg1: memref<1xi32, #tpu.memory_space<smem>>) -> (i32, i32) {
    %c0_i32 = arith.constant 0 : i32
    %c0_i32_0 = arith.constant 0 : i32
    %c0_i32_1 = arith.constant 0 : i32
    return %c0_i32, %c0_i32_0 : i32, i32
  }
}

</mosaic_0001>

<bundles_post_ra>
// kernel: tpu_custom_call.1
= control target key start
LH: loop header
LB: loop body
LE: loop exit
PB: predicated region body
PF: predicated region fallthrough
CT: control target
= control target key end

     0   :  { %14 = vsyncpa [#allocation7], 0  ;;  %s1261_s0 = inlined_call_operand.<no memory space> [shape: s32[1], index: 0, kind: input, shape index: {}]   ;;  %s1262_s1 = inlined_call_operand.hbm [shape: f32[16,1,128], index: 1, kind: input, shape index: {}]   ;;  %s1263_s2 = inlined_call_operand.hbm [shape: bf16[256,512], index: 2, kind: input, shape index: {}]   ;;  %s1264_s3 = inlined_call_operand.hbm [shape: f32[1,512], index: 3, kind: input, shape index: {}]   ;;  %s1265_s4 = inlined_call_operand.vmem [shape: f32[1,128], index: 4, kind: input, shape index: {}]   ;;  %s1266_s5 = inlined_call_operand.vmem [shape: f32[1,128], index: 5, kind: input, shape index: {}]   ;;  %s1267_s6 = inlined_call_operand.hbm [shape: f32[1,1,128], index: 6, kind: output, shape index: {0}]   ;;  %s1268_s7 = inlined_call_operand.hbm [shape: f32[1,128], index: 7, kind: output, shape index: {1}]  }
   0x1   :  { %15 = vsyncpa [#allocation10], 0 }
   0x2   :  { %16 = vsyncpa [#allocation8], 0  ;;  %s35_s26 = sshll.u32 %s1263_s2, 4  ;;  %s36_s26 = int_to_ptr.hbm [resolvable:$true] %s35_s26 }
   0x3   :  { %17 = vsyncpa [#allocation14], 0  ;;  %s1160_s27 = smov [#allocation9]   ;;  %s23_s10 = scalar_lea.hbm %s1262_s1, %s1261_s0 }
   0x4   :  { %s37_s28 = sshll.u32 %s1160_s27, 4  ;;  %s1161_s11 = smov 256   ;;  %s38_s28 = int_to_ptr.vmem [resolvable:$true] %s37_s28 }
   0x5   :  { %s1162_s12 = smov 16   ;;  %s25_s13 = sshll.u32 %s23_s10, 4  ;;  %s26_s13 = int_to_ptr.hbm [resolvable:$true] %s25_s13 }
   0x6   :  { %43 = dma.hbm_to_vmem [thread:$0]  %s36_s26, 8192, %s38_s28, [#allocation10], %s1161_s11, %s1161_s11, %s1162_s12  }
   0x7   :  { %s1163_s14 = smov [#allocation6]   ;;  %s49_s17 = sshll.u32 %s1264_s3, 4  ;;  %s50_s17 = int_to_ptr.hbm [resolvable:$true] %s49_s17 }
   0x8   :  { %s27_s15 = sshll.u32 %s1163_s14, 4  ;;  %s1056_s18 = sshra.s32 %s26_s13, 4  ;;  %s28_s15 = int_to_ptr.vmem [resolvable:$true] %s27_s15  ;;  %s1057_s18 = int_to_ptr.hbm [resolvable:$true] %s1056_s18 }
   0x9   :  { %s1058_s19 = scalar_lea.hbm %s1057_s18, 1  ;;  %s1060_s0 = scalar_lea.hbm %s1262_s1, 16 }
   0xa   :  { %p1059_p0 = scmp.ne.s32.totalorder %s1057_s18, %s1058_s19  ;;  %p1061_p1 = scmp.lt.s32.totalorder %s1057_s18, %s1262_s1 }
   0xb   :  { %p1062_p2 = scmp.lt.s32.totalorder %s1060_s0, %s1058_s19 }
   0xd   :  { %p1063_p3 = por %p1062_p2, %p1061_p1 }
   0xf   :  { %p1064_p4 = pnand %p1063_p3, %p1059_p0 }
  0x11   :  { %1067 = shalt.err (!%p1064_p4)
}
  0x12   :  { %30 = dma.hbm_to_vmem [thread:$0]  %s26_s13, 16, %s28_s15, [#allocation7]  }
  0x13   :  { %s1164_s24 = smov [#allocation11]  }
  0x14   :  { %s51_s3 = sshll.u32 %s1164_s24, 4  ;;  %s52_s3 = int_to_ptr.vmem [resolvable:$true] %s51_s3 }
  0x15   :  { %54 = dma.hbm_to_vmem [thread:$0]  %s50_s17, 64, %s52_s3, [#allocation10]  }
  0x16   :  { %1152 = dma.done.wait [#allocation7], 16  }
  0x17   :  { %1153 = vsyncadd [#allocation7], 4294967280 }
  0x18   :  { %1154 = dma.done.wait [#allocation10], 8256  }
  0x19   :  { %1155 = vsyncadd [#allocation10], 4294959040  ;;  %v800_v0 = vld [vmem:[#allocation9 + $0xe0] sm:$0xf]  ;;  %v975_v1 = vld [vmem:[#allocation9 + $0xec] sm:$0xf0] }
  0x1a   :  { %v973_v2 = vld [vmem:[#allocation9 + $0xe4] sm:$0xf]  ;;  %v801_v3 = vor.u32 %v975_v1, %v800_v0  ;;  %v802_v4 = vld [vmem:[#allocation9 + $0xf0] sm:$0xf0]  ;;  %v928_v9 = vld [vmem:[#allocation9 + $0x1e0] sm:$0xf] }
  0x1b   :  { %v1005_v5 = vld [vmem:[#allocation9 + $0x1e4] sm:$0xf]  ;;  %v930_v6 = vld [vmem:[#allocation9 + $0x1f0] sm:$0xf0]  ;;  %v805_v7 = vor.u32 %v973_v2, %v802_v4  ;;  %v1007_v10 = vld [vmem:[#allocation9 + $0x1ec] sm:$0xf0] }
  0x1c   :  { %v933_v8 = vor.u32 %v1005_v5, %v930_v6  ;;  %v784_v11 = vld [vmem:[#allocation9 + $0xc0] sm:$0xf]  ;;  %480 = vmatpush.bf16.msra.mxu0 %v801_v3  ;;  %v929_v12 = vor.u32 %v1007_v10, %v928_v9  ;;  %v971_v13 = vld [vmem:[#allocation9 + $0xcc] sm:$0xf0]  ;;  %v969_v14 = vld [vmem:[#allocation9 + $0xc4] sm:$0xf] }
  0x1d   :  { %v786_v15 = vld [vmem:[#allocation9 + $0xd0] sm:$0xf0]  ;;  %506 = vmatpush.bf16.msra.mxu2 %v805_v7  ;;  %v785_v16 = vor.u32 %v971_v13, %v784_v11  ;;  %v1001_v18 = vld [vmem:[#allocation9 + $0x1c4] sm:$0xf]  ;;  %v912_v20 = vld [vmem:[#allocation9 + $0x1c0] sm:$0xf] }
  0x1e   :  { %519 = vmatpush.bf16.msra.mxu3 %v933_v8  ;;  %v789_v17 = vor.u32 %v969_v14, %v786_v15  ;;  %v914_v19 = vld [vmem:[#allocation9 + $0x1d0] sm:$0xf0]  ;;  %493 = vmatpush.bf16.msra.mxu1 %v929_v12  ;;  %v1003_v22 = vld [vmem:[#allocation9 + $0x1cc] sm:$0xf0]  ;;  %v768_v23 = vld [vmem:[#allocation9 + $0xa0] sm:$0xf] }
  0x1f   :  { %v917_v21 = vor.u32 %v1001_v18, %v914_v19  ;;  %v967_v24 = vld [vmem:[#allocation9 + $0xac] sm:$0xf0]  ;;  %v913_v25 = vor.u32 %v1003_v22, %v912_v20  ;;  %v965_v26 = vld [vmem:[#allocation9 + $0xa4] sm:$0xf]  ;;  %v770_v27 = vld [vmem:[#allocation9 + $0xb0] sm:$0xf0] }
  0x20   :  { %v997_v28 = vld [vmem:[#allocation9 + $0x1a4] sm:$0xf]  ;;  %481 = vmatpush.bf16.msra.mxu0 %v785_v16  ;;  %v769_v29 = vor.u32 %v967_v24, %v768_v23  ;;  %v898_v30 = vld [vmem:[#allocation9 + $0x1b0] sm:$0xf0]  ;;  %v896_v31 = vld [vmem:[#allocation9 + $0x1a0] sm:$0xf]  ;;  %v773_v33 = vor.u32 %v965_v26, %v770_v27 }
  0x21   :  { %v999_v32 = vld [vmem:[#allocation9 + $0x1ac] sm:$0xf0]  ;;  %507 = vmatpush.bf16.msra.mxu2 %v789_v17  ;;  %v901_v34 = vor.u32 %v997_v28, %v898_v30  ;;  %v752_v35 = vld [vmem:[#allocation9 + $0x80] sm:$0xf]  ;;  %v961_v37 = vld [vmem:[#allocation9 + $0x84] sm:$0xf] }
  0x22   :  { %520 = vmatpush.bf16.msra.mxu3 %v917_v21  ;;  %v963_v36 = vld [vmem:[#allocation9 + $0x8c] sm:$0xf0]  ;;  %494 = vmatpush.bf16.msra.mxu1 %v913_v25  ;;  %v897_v38 = vor.u32 %v999_v32, %v896_v31  ;;  %v754_v39 = vld [vmem:[#allocation9 + $0x90] sm:$0xf0]  ;;  %v993_v40 = vld [vmem:[#allocation9 + $0x184] sm:$0xf] }
  0x23   :  { %v882_v41 = vld [vmem:[#allocation9 + $0x190] sm:$0xf0]  ;;  %v880_v42 = vld [vmem:[#allocation9 + $0x180] sm:$0xf]  ;;  %v995_v43 = vld [vmem:[#allocation9 + $0x18c] sm:$0xf0]  ;;  %v753_v44 = vor.u32 %v963_v36, %v752_v35  ;;  %v757_v45 = vor.u32 %v961_v37, %v754_v39 }
  0x24   :  { %482 = vmatpush.bf16.msra.mxu0 %v769_v29  ;;  %v885_v46 = vor.u32 %v993_v40, %v882_v41  ;;  %v736_v47 = vld [vmem:[#allocation9 + $0x60] sm:$0xf]  ;;  %v959_v48 = vld [vmem:[#allocation9 + $0x6c] sm:$0xf0]  ;;  %v957_v49 = vld [vmem:[#allocation9 + $0x64] sm:$0xf]  ;;  %v881_v50 = vor.u32 %v995_v43, %v880_v42 }
  0x25   :  { %508 = vmatpush.bf16.msra.mxu2 %v773_v33  ;;  %v738_v51 = vld [vmem:[#allocation9 + $0x70] sm:$0xf0]  ;;  %v989_v52 = vld [vmem:[#allocation9 + $0x164] sm:$0xf]  ;;  %v864_v54 = vld [vmem:[#allocation9 + $0x160] sm:$0xf]  ;;  %v737_v56 = vor.u32 %v959_v48, %v736_v47 }
  0x26   :  { %521 = vmatpush.bf16.msra.mxu3 %v901_v34  ;;  %495 = vmatpush.bf16.msra.mxu1 %v897_v38  ;;  %v866_v53 = vld [vmem:[#allocation9 + $0x170] sm:$0xf0]  ;;  %v991_v55 = vld [vmem:[#allocation9 + $0x16c] sm:$0xf0]  ;;  %v741_v57 = vor.u32 %v957_v49, %v738_v51  ;;  %v720_v59 = vld [vmem:[#allocation9 + $0x40] sm:$0xf] }
  0x27   :  { %v869_v58 = vor.u32 %v989_v52, %v866_v53  ;;  %v955_v60 = vld [vmem:[#allocation9 + $0x4c] sm:$0xf0]  ;;  %v953_v61 = vld [vmem:[#allocation9 + $0x44] sm:$0xf]  ;;  %v865_v62 = vor.u32 %v991_v55, %v864_v54  ;;  %v722_v63 = vld [vmem:[#allocation9 + $0x50] sm:$0xf0] }
  0x28   :  { %483 = vmatpush.bf16.msra.mxu0 %v753_v44  ;;  %v985_v0 = vld [vmem:[#allocation9 + $0x144] sm:$0xf]  ;;  %v850_v1 = vld [vmem:[#allocation9 + $0x150] sm:$0xf0]  ;;  %v848_v2 = vld [vmem:[#allocation9 + $0x140] sm:$0xf]  ;;  %v721_v4 = vor.u32 %v955_v60, %v720_v59  ;;  %v725_v6 = vor.u32 %v953_v61, %v722_v63 }
  0x29   :  { %509 = vmatpush.bf16.msra.mxu2 %v757_v45  ;;  %v987_v3 = vld [vmem:[#allocation9 + $0x14c] sm:$0xf0]  ;;  %v704_v5 = vld [vmem:[#allocation9 + $0x20] sm:$0xf]  ;;  %v853_v7 = vor.u32 %v985_v0, %v850_v1  ;;  %v949_v9 = vld [vmem:[#allocation9 + $0x24] sm:$0xf] }
  0x2a   :  { %522 = vmatpush.bf16.msra.mxu3 %v885_v46  ;;  %496 = vmatpush.bf16.msra.mxu1 %v881_v50  ;;  %v951_v8 = vld [vmem:[#allocation9 + $0x2c] sm:$0xf0]  ;;  %v706_v10 = vld [vmem:[#allocation9 + $0x30] sm:$0xf0]  ;;  %v849_v11 = vor.u32 %v987_v3, %v848_v2  ;;  %v981_v12 = vld [vmem:[#allocation9 + $0x124] sm:$0xf] }
  0x2b   :  { %v834_v13 = vld [vmem:[#allocation9 + $0x130] sm:$0xf0]  ;;  %v832_v14 = vld [vmem:[#allocation9 + $0x120] sm:$0xf]  ;;  %v983_v15 = vld [vmem:[#allocation9 + $0x12c] sm:$0xf0]  ;;  %v705_v18 = vor.u32 %v951_v8, %v704_v5  ;;  %v709_v23 = vor.u32 %v949_v9, %v706_v10 }
  0x2c   :  { %484 = vmatpush.bf16.msra.mxu0 %v737_v56  ;;  %v688_v16 = vld [vmem:[#allocation9] sm:$0xf]  ;;  %v947_v17 = vld [vmem:[#allocation9 + $0xc] sm:$0xf0]  ;;  %v945_v19 = vld [vmem:[#allocation9 + $0x4] sm:$0xf]  ;;  %v837_v24 = vor.u32 %v981_v12, %v834_v13  ;;  %v833_v28 = vor.u32 %v983_v15, %v832_v14 }
  0x2d   :  { %510 = vmatpush.bf16.msra.mxu2 %v741_v57  ;;  %v690_v20 = vld [vmem:[#allocation9 + $0x10] sm:$0xf0]  ;;  %v977_v21 = vld [vmem:[#allocation9 + $0x104] sm:$0xf]  ;;  %v808_v25 = vld [vmem:[#allocation9 + $0xe8] sm:$0xf]  ;;  %v689_v34 = vor.u32 %v947_v17, %v688_v16 }
  0x2e   :  { %523 = vmatpush.bf16.msra.mxu3 %v869_v58  ;;  %497 = vmatpush.bf16.msra.mxu1 %v865_v62  ;;  %v818_v22 = vld [vmem:[#allocation9 + $0x110] sm:$0xf0]  ;;  %v80_v26 = vld [vmem:[#allocation6] sm:$0x1]  ;;  %v76_v27 = vld [vmem:[%s1265_s4] sm:$0x1]  ;;  %v693_v38 = vor.u32 %v945_v19, %v690_v20 }
  0x2f   :  { %v976_v29 = vld [vmem:[#allocation9 + $0xf4] sm:$0xf0]  ;;  %v974_v30 = vld [vmem:[#allocation9 + $0xec] sm:$0xf]  ;;  %77 = vst [vmem:[#allocation2] sm:$0x1] %v76_v27  ;;  %v821_v39 = vor.u32 %v977_v21, %v818_v22 }
  0x30   :  { %485 = vmatpush.bf16.msra.mxu0 %v721_v4  ;;  %v810_v31 = vld [vmem:[#allocation9 + $0xf8] sm:$0xf0]  ;;  %v1006_v32 = vld [vmem:[#allocation9 + $0x1ec] sm:$0xf]  ;;  %v816_v35 = vld [vmem:[#allocation9 + $0x100] sm:$0xf]  ;;  %v809_v42 = vor.u32 %v976_v29, %v808_v25 }
  0x31   :  { %511 = vmatpush.bf16.msra.mxu2 %v725_v6  ;;  %v938_v33 = vld [vmem:[#allocation9 + $0x1f8] sm:$0xf0]  ;;  %v979_v36 = vld [vmem:[#allocation9 + $0x10c] sm:$0xf0]  ;;  %v83_v37 = vmax.f32 %v80_v26, 0.0  ;;  %v813_v43 = vor.u32 %v974_v30, %v810_v31  ;;  %s669_s30 = sshll.u32 %s1268_s7, 4  ;;  %s670_s30 = int_to_ptr.hbm [resolvable:$true] %s669_s30 }
  0x32   :  { %524 = vmatpush.bf16.msra.mxu3 %v853_v7  ;;  %498 = vmatpush.bf16.msra.mxu1 %v849_v11  ;;  %v936_v40 = vld [vmem:[#allocation9 + $0x1e8] sm:$0xf]  ;;  %v1008_v41 = vld [vmem:[#allocation9 + $0x1f4] sm:$0xf0]  ;;  %v941_v45 = vor.u32 %v1006_v32, %v938_v33  ;;  %v817_v46 = vor.u32 %v979_v36, %v816_v35  ;;  %v970_v48 = vld [vmem:[#allocation9 + $0xcc] sm:$0xf] }
  0x33   :  { %v792_v44 = vld [vmem:[#allocation9 + $0xc8] sm:$0xf]  ;;  %v972_v47 = vld [vmem:[#allocation9 + $0xd4] sm:$0xf0]  ;;  %v794_v49 = vld [vmem:[#allocation9 + $0xd8] sm:$0xf0]  ;;  %v1228_v50 = vpack.c.bf16 %v83_v37, %v83_v37  ;;  %v937_v51 = vor.u32 %v1008_v41, %v936_v40 }
  0x34   :  { %486 = vmatpush.bf16.msra.mxu0 %v705_v18  ;;  %v1002_v52 = vld [vmem:[#allocation9 + $0x1cc] sm:$0xf]  ;;  %v922_v53 = vld [vmem:[#allocation9 + $0x1d8] sm:$0xf0]  ;;  %v920_v55 = vld [vmem:[#allocation9 + $0x1c8] sm:$0xf]  ;;  %v793_v58 = vor.u32 %v972_v47, %v792_v44  ;;  %v797_v59 = vor.u32 %v970_v48, %v794_v49 }
  0x35   :  { %512 = vmatpush.bf16.msra.mxu2 %v709_v23  ;;  %v1004_v56 = vld [vmem:[#allocation9 + $0x1d4] sm:$0xf0]  ;;  %v776_v60 = vld [vmem:[#allocation9 + $0xa8] sm:$0xf]  ;;  %v925_v61 = vor.u32 %v1002_v52, %v922_v53  ;;  %v966_v63 = vld [vmem:[#allocation9 + $0xac] sm:$0xf] }
  0x36   :  { %525 = vmatpush.bf16.msra.mxu3 %v837_v24  ;;  %499 = vmatpush.bf16.msra.mxu1 %v833_v28  ;;  %v81_v54 = vld [vmem:[#allocation2] sm:$0x1]  ;;  %v968_v62 = vld [vmem:[#allocation9 + $0xb4] sm:$0xf0]  ;;  %v921_v1 = vor.u32 %v1004_v56, %v920_v55  ;;  %v998_v2 = vld [vmem:[#allocation9 + $0x1ac] sm:$0xf] }
  0x37   :  { %v1230_v57 = vpack.c.bf16 %v81_v54, %v81_v54  ;;  %v778_v0 = vld [vmem:[#allocation9 + $0xb8] sm:$0xf0]  ;;  %v904_v4 = vld [vmem:[#allocation9 + $0x1a8] sm:$0xf]  ;;  %v1000_v5 = vld [vmem:[#allocation9 + $0x1b4] sm:$0xf0]  ;;  %v777_v6 = vor.u32 %v968_v62, %v776_v60 }
  0x38   :  { %487 = vmatpush.bf16.msra.mxu0 %v689_v34  ;;  %v906_v3 = vld [vmem:[#allocation9 + $0x1b8] sm:$0xf0]  ;;  %v781_v7 = vor.u32 %v966_v63, %v778_v0  ;;  %v760_v8 = vld [vmem:[#allocation9 + $0x88] sm:$0xf]  ;;  %v964_v10 = vld [vmem:[#allocation9 + $0x94] sm:$0xf0]  ;;  %v905_v13 = vor.u32 %v1000_v5, %v904_v4 }
  0x39   :  { %513 = vmatpush.bf16.msra.mxu2 %v693_v38  ;;  %v909_v9 = vor.u32 %v998_v2, %v906_v3  ;;  %v962_v11 = vld [vmem:[#allocation9 + $0x8c] sm:$0xf]  ;;  %v762_v12 = vld [vmem:[#allocation9 + $0x98] sm:$0xf0]  ;;  %v888_v16 = vld [vmem:[#allocation9 + $0x188] sm:$0xf]  ;;  %v761_v18 = vor.u32 %v964_v10, %v760_v8 }
  0x3a   :  { %526 = vmatpush.bf16.msra.mxu3 %v821_v39  ;;  %500 = vmatpush.bf16.msra.mxu1 %v817_v46  ;;  %v994_v14 = vld [vmem:[#allocation9 + $0x18c] sm:$0xf]  ;;  %v890_v15 = vld [vmem:[#allocation9 + $0x198] sm:$0xf0]  ;;  %v996_v17 = vld [vmem:[#allocation9 + $0x194] sm:$0xf0]  ;;  %v765_v19 = vor.u32 %v962_v11, %v762_v12 }
  0x3b   :  { %488 = vmatmul.bf16.vlgmr.msra.gmra.mxu0 %v1228_v50  ;;  %v744_v20 = vld [vmem:[#allocation9 + $0x68] sm:$0xf]  ;;  %v893_v21 = vor.u32 %v994_v14, %v890_v15  ;;  %v960_v22 = vld [vmem:[#allocation9 + $0x74] sm:$0xf0]  ;;  %v958_v23 = vld [vmem:[#allocation9 + $0x6c] sm:$0xf]  ;;  %v889_v25 = vor.u32 %v996_v17, %v888_v16 }
  0x3c   :  { %532 = vmatpush.bf16.msrb.mxu0 %v809_v42  ;;  %514 = vmatmul.bf16.vlgmr.msra.gmra.mxu2 %v1228_v50  ;;  %v746_v24 = vld [vmem:[#allocation9 + $0x78] sm:$0xf0]  ;;  %v990_v26 = vld [vmem:[#allocation9 + $0x16c] sm:$0xf]  ;;  %v872_v28 = vld [vmem:[#allocation9 + $0x168] sm:$0xf]  ;;  %v745_v30 = vor.u32 %v960_v22, %v744_v20 }
  0x3d   :  { %558 = vmatpush.bf16.msrb.mxu2 %v813_v43  ;;  %527 = vmatmul.bf16.vlgmr.msra.gmra.mxu3 %v1230_v57  ;;  %v874_v27 = vld [vmem:[#allocation9 + $0x178] sm:$0xf0]  ;;  %v992_v29 = vld [vmem:[#allocation9 + $0x174] sm:$0xf0]  ;;  %v749_v31 = vor.u32 %v958_v23, %v746_v24  ;;  %v728_v32 = vld [vmem:[#allocation9 + $0x48] sm:$0xf] }
  0x3e   :  { %571 = vmatpush.bf16.msrb.mxu3 %v941_v45  ;;  %545 = vmatpush.bf16.msrb.mxu1 %v937_v51  ;;  %v877_v33 = vor.u32 %v990_v26, %v874_v27  ;;  %v956_v34 = vld [vmem:[#allocation9 + $0x54] sm:$0xf0]  ;;  %v954_v35 = vld [vmem:[#allocation9 + $0x4c] sm:$0xf]  ;;  %v730_v36 = vld [vmem:[#allocation9 + $0x58] sm:$0xf0]  ;;  %v873_v37 = vor.u32 %v992_v29, %v872_v28 }
  0x3f   :  { %501 = vmatmul.bf16.vlgmr.msra.gmra.mxu1 %v1230_v57  ;;  %v986_v38 = vld [vmem:[#allocation9 + $0x14c] sm:$0xf]  ;;  %v858_v39 = vld [vmem:[#allocation9 + $0x158] sm:$0xf0]  ;;  %v856_v40 = vld [vmem:[#allocation9 + $0x148] sm:$0xf]  ;;  %v729_v42 = vor.u32 %v956_v34, %v728_v32  ;;  %v733_v43 = vor.u32 %v954_v35, %v730_v36 }
  0x40   :  { %533 = vmatpush.bf16.msrb.mxu0 %v793_v58  ;;  %v988_v41 = vld [vmem:[#allocation9 + $0x154] sm:$0xf0]  ;;  %v712_v44 = vld [vmem:[#allocation9 + $0x28] sm:$0xf]  ;;  %v861_v45 = vor.u32 %v986_v38, %v858_v39  ;;  %v950_v47 = vld [vmem:[#allocation9 + $0x2c] sm:$0xf] }
  0x41   :  { %559 = vmatpush.bf16.msrb.mxu2 %v797_v59  ;;  %v952_v46 = vld [vmem:[#allocation9 + $0x34] sm:$0xf0]  ;;  %v714_v48 = vld [vmem:[#allocation9 + $0x38] sm:$0xf0]  ;;  %v857_v49 = vor.u32 %v988_v41, %v856_v40  ;;  %v982_v51 = vld [vmem:[#allocation9 + $0x12c] sm:$0xf] }
  0x42   :  { %572 = vmatpush.bf16.msrb.mxu3 %v925_v61  ;;  %546 = vmatpush.bf16.msrb.mxu1 %v921_v1  ;;  %v842_v52 = vld [vmem:[#allocation9 + $0x138] sm:$0xf0]  ;;  %v840_v53 = vld [vmem:[#allocation9 + $0x128] sm:$0xf]  ;;  %v984_v54 = vld [vmem:[#allocation9 + $0x134] sm:$0xf0]  ;;  %v713_v55 = vor.u32 %v952_v46, %v712_v44  ;;  %v717_v56 = vor.u32 %v950_v47, %v714_v48 }
  0x43   :  { %v696_v58 = vld [vmem:[#allocation9 + $0x8] sm:$0xf]  ;;  %v845_v59 = vor.u32 %v982_v51, %v842_v52  ;;  %v948_v60 = vld [vmem:[#allocation9 + $0x14] sm:$0xf0]  ;;  %v946_v61 = vld [vmem:[#allocation9 + $0xc] sm:$0xf]  ;;  %v841_v63 = vor.u32 %v984_v54, %v840_v53 }
  0x44   :  { %534 = vmatpush.bf16.msrb.mxu0 %v777_v6  ;;  %v698_v62 = vld [vmem:[#allocation9 + $0x18] sm:$0xf0]  ;;  %v978_v0 = vld [vmem:[#allocation9 + $0x10c] sm:$0xf]  ;;  %v824_v2 = vld [vmem:[#allocation9 + $0x108] sm:$0xf]  ;;  %v697_v4 = vor.u32 %v948_v60, %v696_v58 }
  0x45   :  { %560 = vmatpush.bf16.msrb.mxu2 %v781_v7  ;;  %v826_v1 = vld [vmem:[#allocation9 + $0x118] sm:$0xf0]  ;;  %v980_v3 = vld [vmem:[#allocation9 + $0x114] sm:$0xf0]  ;;  %v701_v5 = vor.u32 %v946_v61, %v698_v62  ;;  %v150_v8 = vld [vmem:[#allocation11] sm:$0xf] }
  0x46   :  { %573 = vmatpush.bf16.msrb.mxu3 %v909_v9  ;;  %547 = vmatpush.bf16.msrb.mxu1 %v905_v13  ;;  %v829_v6 = vor.u32 %v978_v0, %v826_v1  ;;  %v825_v7 = vor.u32 %v980_v3, %v824_v2  ;;  %v472_v9 = vperm.slane %v150_v8, 0  ;;  %v78_v10 = vld [vmem:[%s1266_s5] sm:$0x1]  ;;  %v473_v13 = vperm.slane %v150_v8, 1  ;;  %s1165_s5 = smov [#allocation13]   ;;  %s1166_s7 = smov [#allocation12]  }
  0x47   :  { %79 = vst [vmem:[#allocation3] sm:$0x1] %v78_v10  ;;  %v475_v46 = vperm.slane %v150_v8, 3  ;;  %s667_s27 = sshll.u32 %s1165_s5, 4  ;;  %s656_s8 = sshll.u32 %s1166_s7, 4  ;;  %s668_s27 = int_to_ptr.vmem [resolvable:$true] %s667_s27  ;;  %s657_s8 = int_to_ptr.vmem [resolvable:$true] %s656_s8 }
  0x48   :  { %535 = vmatpush.bf16.msrb.mxu0 %v761_v18  ;;  %s658_s11 = sshll.u32 %s1267_s6, 4  ;;  %s659_s11 = int_to_ptr.hbm [resolvable:$true] %s658_s11 }
  0x49   :  { %561 = vmatpush.bf16.msrb.mxu2 %v765_v19 }
  0x4a   :  { %574 = vmatpush.bf16.msrb.mxu3 %v893_v21  ;;  %548 = vmatpush.bf16.msrb.mxu1 %v889_v25 }
  0x4c   :  { %536 = vmatpush.bf16.msrb.mxu0 %v745_v30 }
  0x4d   :  { %562 = vmatpush.bf16.msrb.mxu2 %v749_v31  ;;  %v474_v31 = vperm.slane %v150_v8, 2 }
  0x4e   :  { %575 = vmatpush.bf16.msrb.mxu3 %v877_v33  ;;  %549 = vmatpush.bf16.msrb.mxu1 %v873_v37  ;;  %v82_v60 = vld [vmem:[#allocation3] sm:$0x1] }
  0x50   :  { %537 = vmatpush.bf16.msrb.mxu0 %v729_v42 }
  0x51   :  { %563 = vmatpush.bf16.msrb.mxu2 %v733_v43 }
  0x52   :  { %576 = vmatpush.bf16.msrb.mxu3 %v861_v45  ;;  %550 = vmatpush.bf16.msrb.mxu1 %v857_v49 }
  0x54   :  { %538 = vmatpush.bf16.msrb.mxu0 %v713_v55 }
  0x55   :  { %564 = vmatpush.bf16.msrb.mxu2 %v717_v56 }
  0x56   :  { %577 = vmatpush.bf16.msrb.mxu3 %v845_v59  ;;  %551 = vmatpush.bf16.msrb.mxu1 %v841_v63 }
  0x58   :  { %539 = vmatpush.bf16.msrb.mxu0 %v697_v4 }
  0x59   :  { %565 = vmatpush.bf16.msrb.mxu2 %v701_v5 }
  0x5a   :  { %578 = vmatpush.bf16.msrb.mxu3 %v829_v6  ;;  %552 = vmatpush.bf16.msrb.mxu1 %v825_v7 }
  0x5b   :  { %540 = vmatmul.bf16.vlgmr.msrb.gmra.mxu0 %v1228_v50 }
  0x5c   :  { %566 = vmatmul.bf16.vlgmr.msrb.gmra.mxu2 %v1228_v50 }
  0x5d   :  { %579 = vmatmul.bf16.vlgmr.msrb.gmra.mxu3 %v1230_v57  ;;  %553 = vmatmul.bf16.vlgmr.msrb.gmra.mxu1 %v1230_v57 }
  0xb8   :  { %v489_v11 = vpop.f32.mrf.mxu0 }
  0xb9   :  { %v490_v12 = vadd.f32 %v489_v11, %v472_v9 }
  0xbc   :  { %v502_v14 = vpop.f32.mrf.mxu1 }
  0xbd   :  { %v503_v15 = vadd.f32 %v502_v14, %v490_v12 }
  0xbf   :  { %v515_v16 = vpop.f32.mrf.mxu2  ;;  %v942_v17 = vmul.f32 -1.442695, %v503_v15 }
  0xc0   :  { %v516_v18 = vadd.f32 %v515_v16, %v473_v13  ;;  %v528_v50 = vpop.f32.mrf.mxu3  ;;  %v491_v20 = vpop.f32.mrf.mxu0 }
  0xc1   :  { %1016 = vpow2.f32 %v942_v17 }
  0xc2   :  { %v529_v19 = vadd.f32 %v528_v50, %v516_v18 }
  0xc4   :  { %v943_v57 = vmul.f32 -1.442695, %v529_v19  ;;  %v504_v21 = vpop.f32.mrf.mxu1 }
  0xc6   :  { %1018 = vpow2.f32 %v943_v57 }
  0xc7   :  { %v1017_v22 = vpop.eup %1016  ;;  %v517_v23 = vpop.f32.mrf.mxu2 }
  0xc8   :  { %v587_v24 = vadd.f32 1.0, %v1017_v22  ;;  %v530_v25 = vpop.f32.mrf.mxu3 }
  0xca   :  { %1020 = vrcp.f32 %v587_v24  ;;  %vm593_vm0 = vweird.f32 %v587_v24  ;;  %v597_v36 = vand.u32 2147483647, %v587_v24  ;;  %v599_v39 = vand.u32 2147483648, %v587_v24 }
  0xcc   :  { %v1019_v26 = vpop.eup %1018  ;;  %v600_v51 = vor.u32 1.1754944e-38, %v599_v39  ;;  %vm598_vm6 = vcmp.eq.f32.partialorder %v597_v36, 8.507059e+37 }
  0xcd   :  { %v606_v27 = vadd.f32 1.0, %v1019_v26 }
  0xcf   :  { %1022 = vrcp.f32 %v606_v27  ;;  %vm612_vm2 = vweird.f32 %v606_v27  ;;  %v618_v37 = vand.u32 2147483648, %v606_v27  ;;  %v616_v43 = vand.u32 2147483647, %v606_v27 }
  0xd0   :  { %v1021_v28 = vpop.eup %1020 }
  0xd1   :  { %v589_v29 = vmul.f32 %v1021_v28, %v587_v24  ;;  %vm594_vm1 = vweird.f32 %v1021_v28  ;;  %v619_v49 = vor.u32 1.1754944e-38, %v618_v37  ;;  %vm617_vm7 = vcmp.eq.f32.partialorder %v616_v43, 8.507059e+37 }
  0xd2   :  { %vm1243_vm4 = vmor %vm593_vm0, %vm594_vm1 }
  0xd3   :  { %v590_v30 = vsub.f32 1.0, %v589_v29 }
  0xd5   :  { %v1023_v32 = vpop.eup %1022  ;;  %v591_v33 = vmul.f32 %v1021_v28, %v590_v30 }
  0xd6   :  { %v608_v34 = vmul.f32 %v1023_v32, %v606_v27  ;;  %vm613_vm3 = vweird.f32 %v1023_v32 }
  0xd7   :  { %v592_v42 = vadd.f32 %v1021_v28, %v591_v33  ;;  %vm1247_vm5 = vmor %vm612_vm2, %vm613_vm3 }
  0xd8   :  { %v541_v35 = vpop.f32.mrf.mxu0  ;;  %v609_v40 = vsub.f32 1.0, %v608_v34 }
  0xd9   :  { %v542_v38 = vadd.f32 %v541_v35, %v474_v31  ;;  %v596_v52 = vsel %vm1243_vm4, %v1021_v28, %v592_v42 }
  0xda   :  { %v554_v41 = vpop.f32.mrf.mxu1  ;;  %v610_v47 = vmul.f32 %v1023_v32, %v609_v40  ;;  %v601_v61 = vsel %vm598_vm6, %v600_v51, %v596_v52 }
  0xdb   :  { %v555_v44 = vadd.f32 %v554_v41, %v542_v38 }
  0xdc   :  { %v611_v53 = vadd.f32 %v1023_v32, %v610_v47 }
  0xdd   :  { %1024 = vtanh.f32 %v555_v44 }
  0xde   :  { %v615_v58 = vsel %vm1247_vm5, %v1023_v32, %v611_v53 }
  0xdf   :  { %v567_v54 = vpop.f32.mrf.mxu2  ;;  %v620_v62 = vsel %vm617_vm7, %v619_v49, %v615_v58 }
  0xe0   :  { %v568_v55 = vadd.f32 %v567_v54, %v475_v46  ;;  %v580_v56 = vpop.f32.mrf.mxu3  ;;  %v543_v59 = vpop.f32.mrf.mxu0  ;;  %v642_v3 = vmul.f32 %v620_v62, %v82_v60 }
  0xe2   :  { %v581_v63 = vadd.f32 %v580_v56, %v568_v55  ;;  %v556_v0 = vpop.f32.mrf.mxu1 }
  0xe3   :  { %v1025_v1 = vpop.eup %1024 }
  0xe4   :  { %v944_v2 = vmul.f32 -1.442695, %v581_v63  ;;  %v643_v4 = vmul.f32 %v1025_v1, %v601_v61 }
  0xe6   :  { %1026 = vpow2.f32 %v944_v2  ;;  %v644_v5 = vadd.f32 %v643_v4, %v642_v3 }
  0xe7   :  { %v569_v6 = vpop.f32.mrf.mxu2 }
  0xe8   :  { %v582_v7 = vpop.f32.mrf.mxu3  ;;  %648 = vst [vmem:[#allocation3] sm:$0x1] %v644_v5 }
  0xe9   :  { %650 = vst [vmem:[#allocation13] sm:$0x1] %v644_v5 }
  0xea   :  { %672 = dma.vmem_to_hbm [thread:$0]  %s668_s27, 16, %s670_s30, [#allocation14]  }
  0xec   :  { %v1027_v8 = vpop.eup %1026 }
  0xed   :  { %v626_v9 = vadd.f32 1.0, %v1027_v8 }
  0xef   :  { %1028 = vrcp.f32 %v626_v9  ;;  %v638_v13 = vand.u32 2147483648, %v626_v9  ;;  %v636_v15 = vand.u32 2147483647, %v626_v9  ;;  %vm632_vm9 = vweird.f32 %v626_v9 }
  0xf0   :  { %1030 = vtanh.f32 %v644_v5 }
  0xf1   :  { %v639_v17 = vor.u32 1.1754944e-38, %v638_v13  ;;  %vm637_vm11 = vcmp.eq.f32.partialorder %v636_v15, 8.507059e+37 }
  0xf5   :  { %v1029_v10 = vpop.eup %1028 }
  0xf6   :  { %v628_v11 = vmul.f32 %v1029_v10, %v626_v9  ;;  %vm633_vm8 = vweird.f32 %v1029_v10  ;;  %v1031_v50 = vpop.eup %1030 }
  0xf7   :  { %vm634_vm10 = vmor %vm632_vm9, %vm633_vm8 }
  0xf8   :  { %v629_v12 = vsub.f32 1.0, %v628_v11 }
  0xfa   :  { %v630_v14 = vmul.f32 %v1029_v10, %v629_v12 }
  0xfc   :  { %v631_v16 = vadd.f32 %v1029_v10, %v630_v14 }
  0xfe   :  { %v635_v18 = vsel %vm634_vm10, %v1029_v10, %v631_v16 }
  0xff   :  { %v640_v19 = vsel %vm637_vm11, %v639_v17, %v635_v18 }
 0x100   :  { %v646_v20 = vmul.f32 %v1031_v50, %v640_v19 }
 0x102   :  { %647 = vst [vmem:[#allocation2] sm:$0x1] %v646_v20 }
 0x103   :  { %649 = vst [vmem:[#allocation12] sm:$0x1] %v646_v20 }
 0x104   :  { %661 = dma.vmem_to_hbm [thread:$0]  %s657_s8, 16, %s659_s11, [#allocation8]  }
 0x105   :  { %1156 = dma.done.wait [#allocation8], 16  }
 0x106   :  { %1157 = vsyncadd [#allocation8], 4294967280 }
 0x107   :  { %1158 = dma.done.wait [#allocation14], 16  }
 0x108   :  { %1159 = vsyncadd [#allocation14], 4294967280 }
 0x109   :  { %681 = vsyncpa [#allocation7], 1 }
 0x10a   :  { %682 = vsyncpa [#allocation10], 1 }
 0x10b   :  { %683 = vsyncpa [#allocation8], 1 }
 0x10c   :  { %684 = vsyncpa [#allocation14], 1 }

</bundles_post_ra>
